<compile_context>
chip_gen: v6e
topology: v6e:2x2x1
jax: 0.10.0
libtpu: 0.0.40
codegen_flags: <defaults>
</compile_context>

<pallas_src>
import jax
import jax.numpy as jnp
from jax.experimental import pallas as pl
from jax.experimental.pallas import tpu as pltpu

BN_EPS = 1e-5
LANE = 128


def _round_up(x, m):
    return (x + m - 1) // m * m


# ----------------------------- fused Pallas kernel ---------------------------

def _make_fused_kernel(n_tables, vocab_offsets, n_hidden, vp):
    """Embedding lookup as one multi-hot matmul over the combined vocabulary,
    then the whole MLP, all in vregs/VMEM; single lane-dense store."""

    def kernel(*refs):
        x_cat_ref = refs[0]                      # (TB, n_cols) int32
        big_ref = refs[1]                        # (Vp, D0p) combined emb table
        w_refs = refs[2:2 + n_hidden]            # (Din_p, Dout_p) each
        wf_ref = refs[2 + n_hidden]              # (Dlast_p, OUTp)
        pack_ref = refs[3 + n_hidden]            # (n_hidden+1, 3, Pmax) f32
        o_ref = refs[4 + n_hidden]               # (TB, OUTp) f32

        tb = x_cat_ref.shape[0]
        cdt = big_ref.dtype                      # MXU input dtype (f32 or bf16)

        # Multi-hot over the combined vocabulary: each table occupies a
        # disjoint (vocab rows, feature cols) block of big_ref, so
        # (sum_t onehot_t) @ big == concat_t(embedding_t lookup).
        # Mask is built in f32 on the VPU (v5e has no bf16 VALU) and cast
        # only at the MXU input.
        iota = jax.lax.broadcasted_iota(jnp.int32, (tb, vp), 1)
        m = jnp.zeros((tb, vp), jnp.float32)
        for t in range(n_tables):
            gidx = x_cat_ref[:, t:t + 1] + vocab_offsets[t]       # (TB, 1)
            m = m + (gidx == iota).astype(jnp.float32)
        h = jnp.dot(m.astype(cdt), big_ref[...],
                    preferred_element_type=jnp.float32)

        # embedding_dropout / Dropout(p): identity in eval mode.
        # pack rows: 0 = Linear bias, 1 = folded BN scale, 2 = folded BN shift.
        for l in range(n_hidden):
            w_ref = w_refs[l]
            ow = w_ref.shape[1]
            y = jnp.dot(h.astype(cdt), w_ref[...],
                        preferred_element_type=jnp.float32)
            y = jnp.maximum(y + pack_ref[l, 0:1, :ow], 0.0)
            h = y * pack_ref[l, 1:2, :ow] + pack_ref[l, 2:3, :ow]

        ow = wf_ref.shape[1]
        y = jnp.dot(h.astype(cdt), wf_ref[...],
                    preferred_element_type=jnp.float32)
        o_ref[...] = (y + pack_ref[n_hidden, 0:1, :ow]).astype(o_ref.dtype)

    return kernel


# ------------------------------ parameters -----------------------------------

def init_params(key, embedding_size, output_size, layers):
    """Deterministic init mirroring the PyTorch module's parameter shapes."""
    params = {"embeddings": [], "hidden": [], "final": None}
    num_categorical_cols = sum(nf for _, nf in embedding_size)

    # nn.Embedding(ni, nf): weight ~ N(0, 1)
    for (ni, nf) in embedding_size:
        key, sub = jax.random.split(key)
        params["embeddings"].append(
            jax.random.normal(sub, (ni, nf), dtype=jnp.float32))

    in_f = num_categorical_cols
    for out_f in layers:
        key, kw, kb = jax.random.split(key, 3)
        bound = 1.0 / jnp.sqrt(in_f)
        # stored as [in, out] (PyTorch Linear weight is [out, in])
        w = jax.random.uniform(kw, (in_f, out_f), jnp.float32, -bound, bound)
        b = jax.random.uniform(kb, (out_f,), jnp.float32, -bound, bound)
        # BatchNorm1d defaults: weight=1, bias=0, running_mean=0, running_var=1
        params["hidden"].append({
            "w": w, "b": b,
            "gamma": jnp.ones((out_f,), jnp.float32),
            "beta": jnp.zeros((out_f,), jnp.float32),
            "mean": jnp.zeros((out_f,), jnp.float32),
            "var": jnp.ones((out_f,), jnp.float32),
        })
        in_f = out_f

    key, kw, kb = jax.random.split(key, 3)
    bound = 1.0 / jnp.sqrt(layers[-1])
    params["final"] = {
        "w": jax.random.uniform(kw, (layers[-1], output_size),
                                jnp.float32, -bound, bound),
        "b": jax.random.uniform(kb, (output_size,), jnp.float32, -bound, bound),
    }
    return params


def pack_params(params, embedding_size, output_size, layers,
                weights_dtype=jnp.float32):
    """Fold BN into (scale, shift); pad each feature axis independently to a
    128 multiple; build the combined (vocab, feature)-offset embedding table;
    consolidate all bias/scale/shift vectors into one (L+1, 3, Pmax) array."""
    d_tot = sum(nf for _, nf in embedding_size)
    v_tot = sum(ni for ni, _ in embedding_size)
    n_hidden = len(layers)

    Vp = _round_up(v_tot, LANE)                            # lane-dense one-hot
    dims_pad = [_round_up(d, LANE) for d in [d_tot] + list(layers)]
    out_pad = _round_up(output_size, LANE)
    Pmax = max(dims_pad[1:] + [out_pad])

    big = jnp.zeros((Vp, dims_pad[0]), jnp.float32)
    voff = foff = 0
    for table, (ni, nf) in zip(params["embeddings"], embedding_size):
        big = big.at[voff:voff + ni, foff:foff + nf].set(table)
        voff += ni
        foff += nf

    ws = []
    pack = jnp.zeros((n_hidden + 1, 3, Pmax), jnp.float32)
    for l, layer in enumerate(params["hidden"]):
        in_f, out_f = layer["w"].shape
        w = (jnp.zeros((dims_pad[l], dims_pad[l + 1]), jnp.float32)
             .at[:in_f, :out_f].set(layer["w"]))
        ws.append(w.astype(weights_dtype))
        scale = layer["gamma"] * jax.lax.rsqrt(layer["var"] + BN_EPS)
        shift = layer["beta"] - layer["mean"] * scale
        pack = pack.at[l, 0, :out_f].set(layer["b"])
        pack = pack.at[l, 1, :out_f].set(scale)
        pack = pack.at[l, 2, :out_f].set(shift)

    in_f, out_f = params["final"]["w"].shape
    wf = (jnp.zeros((dims_pad[-1], out_pad), jnp.float32)
          .at[:in_f, :out_f].set(params["final"]["w"])).astype(weights_dtype)
    pack = pack.at[n_hidden, 0, :out_f].set(params["final"]["b"])

    return {"big": big.astype(weights_dtype), "ws": ws, "wf": wf, "pack": pack,
            "Vp": Vp, "out_pad": out_pad}


# ------------------------------ fused forward --------------------------------

def forward(packed, x_categorical, embedding_size, output_size, layers):
    B, n_cols = x_categorical.shape
    n_hidden = len(layers)
    Vp = packed["Vp"]
    out_pad = packed["out_pad"]

    # Large batch tiles amortize the per-grid-step pipeline overhead (weights
    # are resident, so per-step DMA traffic is tiny). 512 keeps >=2 tiles at
    # realistic deployment batches (v7x megacore) and is far under VMEM.
    TB = min(_round_up(B, 8), 512)
    Bp = _round_up(B, TB)
    if Bp != B:
        x_categorical = jnp.pad(x_categorical, ((0, Bp - B), (0, 0)))

    vocab_offsets = []
    off = 0
    for ni, _ in embedding_size:
        vocab_offsets.append(off)
        off += ni

    kernel = _make_fused_kernel(len(embedding_size), vocab_offsets, n_hidden, Vp)

    weight_arrays = [packed["big"], *packed["ws"], packed["wf"], packed["pack"]]
    weight_bytes = sum(int(a.size) * a.dtype.itemsize for a in weight_arrays)
    tile_bytes = TB * (n_cols * 4 + out_pad * 4)
    vmem_limit = int(min(max(4 * (weight_bytes + tile_bytes) + (2 << 20),
                             8 << 20), 32 << 20))

    def run(single_buffer):
        def resident(arr):
            shape = arr.shape
            nd = len(shape)
            imap = lambda i: (0,) * nd
            if single_buffer:
                # Constant-index blocks never change across grid steps;
                # single-buffering halves their VMEM footprint.
                return pl.BlockSpec(shape, imap, pipeline_mode=pl.Buffered(1))
            return pl.BlockSpec(shape, imap)

        in_specs = [pl.BlockSpec((TB, n_cols), lambda i: (i, 0))]
        in_specs += [resident(a) for a in weight_arrays]

        return pl.pallas_call(
            kernel,
            out_shape=jax.ShapeDtypeStruct((Bp, out_pad), jnp.float32),
            grid=(Bp // TB,),
            in_specs=in_specs,
            out_specs=pl.BlockSpec((TB, out_pad), lambda i: (i, 0)),
            compiler_params=pltpu.CompilerParams(
                dimension_semantics=("parallel",),
                vmem_limit_bytes=vmem_limit),
        )(x_categorical, *weight_arrays)

    try:
        out = run(single_buffer=True)
    except Exception:
        # pipeline_mode / Buffered(1) not supported by this JAX build:
        # fall back to default double-buffered resident blocks.
        out = run(single_buffer=False)
    return out[:B, :output_size]


# --------------------------- pure-JAX reference -------------------------------

def forward_reference(params, x_categorical):
    embs = [jnp.take(t, x_categorical[:, i], axis=0)
            for i, t in enumerate(params["embeddings"])]
    x = jnp.concatenate(embs, axis=1)
    for layer in params["hidden"]:
        y = jnp.maximum(x @ layer["w"] + layer["b"], 0.0)
        inv = jax.lax.rsqrt(layer["var"] + BN_EPS)
        x = (y - layer["mean"]) * inv * layer["gamma"] + layer["beta"]
    return x @ params["final"]["w"] + params["final"]["b"]


# ----------------------------------- main -------------------------------------

if __name__ == "__main__":
    embedding_size = [(10, 4), (12, 8), (6, 4)]   # (num_embeddings, emb_dim)
    output_size = 4
    layers = [32, 16]
    batch = 8

    root = jax.random.PRNGKey(0)
    kparams, kx = jax.random.split(root)
    params = init_params(kparams, embedding_size, output_size, layers)

    cols = []
    for (ni, _) in embedding_size:
        kx, sub = jax.random.split(kx)
        cols.append(jax.random.randint(sub, (batch, 1), 0, ni, dtype=jnp.int32))
    x_categorical = jnp.concatenate(cols, axis=1)   # [batch, n_cols] int32

    ref = forward_reference(params, x_categorical)

    # f32 weights: exact path (matches the PyTorch eval forward tightly).
    packed32 = pack_params(params, embedding_size, output_size, layers,
                           weights_dtype=jnp.float32)
    out32 = jax.block_until_ready(
        forward(packed32, x_categorical, embedding_size, output_size, layers))
    assert out32.shape == (batch, output_size)
    assert out32.dtype == jnp.float32
    assert jnp.allclose(out32, ref, atol=1e-3, rtol=1e-3)

    # bf16 weights (deployment path for v5e/v6e/v7x MXU rate / half footprint);
    # VPU math and accumulation stay f32, so only bf16 rounding remains.
    packed16 = pack_params(params, embedding_size, output_size, layers,
                           weights_dtype=jnp.bfloat16)
    out16 = jax.block_until_ready(
        forward(packed16, x_categorical, embedding_size, output_size, layers))
    assert out16.shape == (batch, output_size)
    assert jnp.allclose(out16, ref, atol=1e-1, rtol=1e-1)

    print("KERNEL_OK")
</pallas_src>

<mosaic_0001>
module attributes {stable_mosaic.version = 11 : i64} {
  func.func @kernel(%arg0: i32, %arg1: memref<8x3xi32, #tpu.memory_space<vmem>>, %arg2: memref<128x128xf32, #tpu.memory_space<vmem>>, %arg3: memref<128x128xf32, #tpu.memory_space<vmem>>, %arg4: memref<128x128xf32, #tpu.memory_space<vmem>>, %arg5: memref<128x128xf32, #tpu.memory_space<vmem>>, %arg6: memref<3x3x128xf32, #tpu.memory_space<vmem>>, %arg7: memref<8x128xf32, #tpu.memory_space<vmem>>) attributes {dimension_semantics = [#tpu.dimension_semantics<parallel>], iteration_bounds = array<i64: 1>, scalar_prefetch = 0 : i64, scratch_operands = 0 : i64, tpu.core_type = #tpu.core_type<tc>, window_params = [{transform_indices = @transform_0, window_bounds = array<i64: 8, 3>}, {pipeline_mode = #tpu.pipeline_mode<synchronous>, transform_indices = @transform_1, window_bounds = array<i64: 128, 128>}, {pipeline_mode = #tpu.pipeline_mode<synchronous>, transform_indices = @transform_2, window_bounds = array<i64: 128, 128>}, {pipeline_mode = #tpu.pipeline_mode<synchronous>, transform_indices = @transform_3, window_bounds = array<i64: 128, 128>}, {pipeline_mode = #tpu.pipeline_mode<synchronous>, transform_indices = @transform_4, window_bounds = array<i64: 128, 128>}, {pipeline_mode = #tpu.pipeline_mode<synchronous>, transform_indices = @transform_5, window_bounds = array<i64: 3, 3, 128>}, {transform_indices = @transform_6, window_bounds = array<i64: 8, 128>}]} {
    %0 = tpu.iota {dimensions = array<i32: 1>} : vector<8x128xi32>
    %cst = arith.constant 0.000000e+00 : f32
    %1 = vector.broadcast %cst : f32 to vector<8x128xf32>
    %c0 = arith.constant 0 : index
    %c0_0 = arith.constant 0 : index
    %2 = vector.load %arg1[%c0, %c0_0] : memref<8x3xi32, #tpu.memory_space<vmem>>, vector<8x1xi32>
    %c0_i32 = arith.constant 0 : i32
    %3 = vector.broadcast %c0_i32 : i32 to vector<8x1xi32>
    %4 = arith.addi %2, %3 : vector<8x1xi32>
    %5 = vector.broadcast %4 : vector<8x1xi32> to vector<8x128xi32>
    %6 = arith.cmpi eq, %5, %0 : vector<8x128xi32>
    %7 = arith.extui %6 : vector<8x128xi1> to vector<8x128xi32>
    %8 = arith.sitofp %7 : vector<8x128xi32> to vector<8x128xf32>
    %9 = arith.addf %1, %8 : vector<8x128xf32>
    %c0_1 = arith.constant 0 : index
    %c1 = arith.constant 1 : index
    %10 = vector.load %arg1[%c0_1, %c1] : memref<8x3xi32, #tpu.memory_space<vmem>>, vector<8x1xi32>
    %c10_i32 = arith.constant 10 : i32
    %11 = vector.broadcast %c10_i32 : i32 to vector<8x1xi32>
    %12 = arith.addi %10, %11 : vector<8x1xi32>
    %13 = vector.broadcast %12 : vector<8x1xi32> to vector<8x128xi32>
    %14 = arith.cmpi eq, %13, %0 : vector<8x128xi32>
    %15 = arith.extui %14 : vector<8x128xi1> to vector<8x128xi32>
    %16 = arith.sitofp %15 : vector<8x128xi32> to vector<8x128xf32>
    %17 = arith.addf %9, %16 : vector<8x128xf32>
    %c0_2 = arith.constant 0 : index
    %c2 = arith.constant 2 : index
    %18 = vector.load %arg1[%c0_2, %c2] : memref<8x3xi32, #tpu.memory_space<vmem>>, vector<8x1xi32>
    %c22_i32 = arith.constant 22 : i32
    %19 = vector.broadcast %c22_i32 : i32 to vector<8x1xi32>
    %20 = arith.addi %18, %19 : vector<8x1xi32>
    %21 = vector.broadcast %20 : vector<8x1xi32> to vector<8x128xi32>
    %22 = arith.cmpi eq, %21, %0 : vector<8x128xi32>
    %23 = arith.extui %22 : vector<8x128xi1> to vector<8x128xi32>
    %24 = arith.sitofp %23 : vector<8x128xi32> to vector<8x128xf32>
    %25 = arith.addf %17, %24 : vector<8x128xf32>
    %c0_3 = arith.constant 0 : index
    %c0_4 = arith.constant 0 : index
    %26 = vector.load %arg2[%c0_3, %c0_4] : memref<128x128xf32, #tpu.memory_space<vmem>>, vector<128x128xf32>
    %cst_5 = arith.constant dense<0.000000e+00> : vector<8x128xf32>
    %27 = tpu.matmul %25, %26, %cst_5 {dimension_numbers = #tpu.dot_dimension_numbers<[1], [0], [0], [1], [0, 0, 1, 1], [], []>} : vector<8x128xf32>, vector<128x128xf32>, vector<8x128xf32> -> vector<8x128xf32>
    %c0_6 = arith.constant 0 : index
    %c0_7 = arith.constant 0 : index
    %28 = vector.load %arg3[%c0_6, %c0_7] : memref<128x128xf32, #tpu.memory_space<vmem>>, vector<128x128xf32>
    %cst_8 = arith.constant dense<0.000000e+00> : vector<8x128xf32>
    %29 = tpu.matmul %27, %28, %cst_8 {dimension_numbers = #tpu.dot_dimension_numbers<[1], [0], [0], [1], [0, 0, 1, 1], [], []>} : vector<8x128xf32>, vector<128x128xf32>, vector<8x128xf32> -> vector<8x128xf32>
    %c0_9 = arith.constant 0 : index
    %c0_10 = arith.constant 0 : index
    %c0_11 = arith.constant 0 : index
    %30 = vector.load %arg6[%c0_9, %c0_10, %c0_11] : memref<3x3x128xf32, #tpu.memory_space<vmem>>, vector<1x1x128xf32>
    %31 = vector.shape_cast %30 : vector<1x1x128xf32> to vector<1x128xf32>
    %32 = vector.broadcast %31 : vector<1x128xf32> to vector<8x128xf32>
    %33 = arith.addf %29, %32 : vector<8x128xf32>
    %cst_12 = arith.constant 0.000000e+00 : f32
    %34 = vector.broadcast %cst_12 : f32 to vector<8x128xf32>
    %35 = arith.maximumf %33, %34 : vector<8x128xf32>
    %c0_13 = arith.constant 0 : index
    %c1_14 = arith.constant 1 : index
    %c0_15 = arith.constant 0 : index
    %36 = vector.load %arg6[%c0_13, %c1_14, %c0_15] : memref<3x3x128xf32, #tpu.memory_space<vmem>>, vector<1x1x128xf32>
    %37 = vector.shape_cast %36 : vector<1x1x128xf32> to vector<1x128xf32>
    %38 = vector.broadcast %37 : vector<1x128xf32> to vector<8x128xf32>
    %39 = arith.mulf %35, %38 : vector<8x128xf32>
    %c0_16 = arith.constant 0 : index
    %c2_17 = arith.constant 2 : index
    %c0_18 = arith.constant 0 : index
    %40 = vector.load %arg6[%c0_16, %c2_17, %c0_18] : memref<3x3x128xf32, #tpu.memory_space<vmem>>, vector<1x1x128xf32>
    %41 = vector.shape_cast %40 : vector<1x1x128xf32> to vector<1x128xf32>
    %42 = vector.broadcast %41 : vector<1x128xf32> to vector<8x128xf32>
    %43 = arith.addf %39, %42 : vector<8x128xf32>
    %c0_19 = arith.constant 0 : index
    %c0_20 = arith.constant 0 : index
    %44 = vector.load %arg4[%c0_19, %c0_20] : memref<128x128xf32, #tpu.memory_space<vmem>>, vector<128x128xf32>
    %cst_21 = arith.constant dense<0.000000e+00> : vector<8x128xf32>
    %45 = tpu.matmul %43, %44, %cst_21 {dimension_numbers = #tpu.dot_dimension_numbers<[1], [0], [0], [1], [0, 0, 1, 1], [], []>} : vector<8x128xf32>, vector<128x128xf32>, vector<8x128xf32> -> vector<8x128xf32>
    %c1_22 = arith.constant 1 : index
    %c0_23 = arith.constant 0 : index
    %c0_24 = arith.constant 0 : index
    %46 = vector.load %arg6[%c1_22, %c0_23, %c0_24] : memref<3x3x128xf32, #tpu.memory_space<vmem>>, vector<1x1x128xf32>
    %47 = vector.shape_cast %46 : vector<1x1x128xf32> to vector<1x128xf32>
    %48 = vector.broadcast %47 : vector<1x128xf32> to vector<8x128xf32>
    %49 = arith.addf %45, %48 : vector<8x128xf32>
    %cst_25 = arith.constant 0.000000e+00 : f32
    %50 = vector.broadcast %cst_25 : f32 to vector<8x128xf32>
    %51 = arith.maximumf %49, %50 : vector<8x128xf32>
    %c1_26 = arith.constant 1 : index
    %c1_27 = arith.constant 1 : index
    %c0_28 = arith.constant 0 : index
    %52 = vector.load %arg6[%c1_26, %c1_27, %c0_28] : memref<3x3x128xf32, #tpu.memory_space<vmem>>, vector<1x1x128xf32>
    %53 = vector.shape_cast %52 : vector<1x1x128xf32> to vector<1x128xf32>
    %54 = vector.broadcast %53 : vector<1x128xf32> to vector<8x128xf32>
    %55 = arith.mulf %51, %54 : vector<8x128xf32>
    %c1_29 = arith.constant 1 : index
    %c2_30 = arith.constant 2 : index
    %c0_31 = arith.constant 0 : index
    %56 = vector.load %arg6[%c1_29, %c2_30, %c0_31] : memref<3x3x128xf32, #tpu.memory_space<vmem>>, vector<1x1x128xf32>
    %57 = vector.shape_cast %56 : vector<1x1x128xf32> to vector<1x128xf32>
    %58 = vector.broadcast %57 : vector<1x128xf32> to vector<8x128xf32>
    %59 = arith.addf %55, %58 : vector<8x128xf32>
    %c0_32 = arith.constant 0 : index
    %c0_33 = arith.constant 0 : index
    %60 = vector.load %arg5[%c0_32, %c0_33] : memref<128x128xf32, #tpu.memory_space<vmem>>, vector<128x128xf32>
    %cst_34 = arith.constant dense<0.000000e+00> : vector<8x128xf32>
    %61 = tpu.matmul %59, %60, %cst_34 {dimension_numbers = #tpu.dot_dimension_numbers<[1], [0], [0], [1], [0, 0, 1, 1], [], []>} : vector<8x128xf32>, vector<128x128xf32>, vector<8x128xf32> -> vector<8x128xf32>
    %c2_35 = arith.constant 2 : index
    %c0_36 = arith.constant 0 : index
    %c0_37 = arith.constant 0 : index
    %62 = vector.load %arg6[%c2_35, %c0_36, %c0_37] : memref<3x3x128xf32, #tpu.memory_space<vmem>>, vector<1x1x128xf32>
    %63 = vector.shape_cast %62 : vector<1x1x128xf32> to vector<1x128xf32>
    %64 = vector.broadcast %63 : vector<1x128xf32> to vector<8x128xf32>
    %65 = arith.addf %61, %64 : vector<8x128xf32>
    %c0_38 = arith.constant 0 : index
    %c0_39 = arith.constant 0 : index
    %66 = vector.load %arg7[%c0_38, %c0_39] : memref<8x128xf32, #tpu.memory_space<vmem>>, vector<8x128xf32>
    tpu.vector_store %arg7[%c0_38, %c0_39], %65 {strides = array<i32>} : memref<8x128xf32, #tpu.memory_space<vmem>>, vector<8x128xf32>,
    return
  }
  func.func @transform_0(%arg0: i32) -> (i32, i32) {
    %c0_i32 = arith.constant 0 : i32
    %c0_i32_0 = arith.constant 0 : i32
    return %arg0, %c0_i32 : i32, i32
  }
  func.func @transform_1(%arg0: i32) -> (i32, i32) {
    %c0_i32 = arith.constant 0 : i32
    %c0_i32_0 = arith.constant 0 : i32
    %c0_i32_1 = arith.constant 0 : i32
    return %c0_i32, %c0_i32_0 : i32, i32
  }
  func.func @transform_2(%arg0: i32) -> (i32, i32) {
    %c0_i32 = arith.constant 0 : i32
    %c0_i32_0 = arith.constant 0 : i32
    %c0_i32_1 = arith.constant 0 : i32
    return %c0_i32, %c0_i32_0 : i32, i32
  }
  func.func @transform_3(%arg0: i32) -> (i32, i32) {
    %c0_i32 = arith.constant 0 : i32
    %c0_i32_0 = arith.constant 0 : i32
    %c0_i32_1 = arith.constant 0 : i32
    return %c0_i32, %c0_i32_0 : i32, i32
  }
  func.func @transform_4(%arg0: i32) -> (i32, i32) {
    %c0_i32 = arith.constant 0 : i32
    %c0_i32_0 = arith.constant 0 : i32
    %c0_i32_1 = arith.constant 0 : i32
    return %c0_i32, %c0_i32_0 : i32, i32
  }
  func.func @transform_5(%arg0: i32) -> (i32, i32, i32) {
    %c0_i32 = arith.constant 0 : i32
    %c0_i32_0 = arith.constant 0 : i32
    %c0_i32_1 = arith.constant 0 : i32
    %c0_i32_2 = arith.constant 0 : i32
    return %c0_i32, %c0_i32_0, %c0_i32_1 : i32, i32, i32
  }
  func.func @transform_6(%arg0: i32) -> (i32, i32) {
    %c0_i32 = arith.constant 0 : i32
    %c0_i32_0 = arith.constant 0 : i32
    return %arg0, %c0_i32 : i32, i32
  }
}

module attributes {stable_mosaic.version = 11 : i64} {
  func.func @kernel(%arg0: i32, %arg1: memref<8x3xi32, #tpu.memory_space<vmem>>, %arg2: memref<128x128xf32, #tpu.memory_space<vmem>>, %arg3: memref<128x128xf32, #tpu.memory_space<vmem>>, %arg4: memref<128x128xf32, #tpu.memory_space<vmem>>, %arg5: memref<128x128xf32, #tpu.memory_space<vmem>>, %arg6: memref<3x3x128xf32, #tpu.memory_space<vmem>>, %arg7: memref<8x128xf32, #tpu.memory_space<vmem>>) attributes {dimension_semantics = [#tpu.dimension_semantics<parallel>], iteration_bounds = array<i64: 1>, scalar_prefetch = 0 : i64, scratch_operands = 0 : i64, tpu.core_type = #tpu.core_type<tc>, window_params = [{transform_indices = @transform_0, window_bounds = array<i64: 8, 3>}, {pipeline_mode = #tpu.pipeline_mode<synchronous>, transform_indices = @transform_1, window_bounds = array<i64: 128, 128>}, {pipeline_mode = #tpu.pipeline_mode<synchronous>, transform_indices = @transform_2, window_bounds = array<i64: 128, 128>}, {pipeline_mode = #tpu.pipeline_mode<synchronous>, transform_indices = @transform_3, window_bounds = array<i64: 128, 128>}, {pipeline_mode = #tpu.pipeline_mode<synchronous>, transform_indices = @transform_4, window_bounds = array<i64: 128, 128>}, {pipeline_mode = #tpu.pipeline_mode<synchronous>, transform_indices = @transform_5, window_bounds = array<i64: 3, 3, 128>}, {transform_indices = @transform_6, window_bounds = array<i64: 8, 128>}]} {
    %0 = tpu.iota {dimensions = array<i32: 1>} : vector<8x128xi32>
    %cst = arith.constant 0.000000e+00 : f32
    %1 = vector.broadcast %cst : f32 to vector<8x128xf32>
    %c0 = arith.constant 0 : index
    %c0_0 = arith.constant 0 : index
    %2 = vector.load %arg1[%c0, %c0_0] : memref<8x3xi32, #tpu.memory_space<vmem>>, vector<8x1xi32>
    %c0_i32 = arith.constant 0 : i32
    %3 = vector.broadcast %c0_i32 : i32 to vector<8x1xi32>
    %4 = arith.addi %2, %3 : vector<8x1xi32>
    %5 = vector.broadcast %4 : vector<8x1xi32> to vector<8x128xi32>
    %6 = arith.cmpi eq, %5, %0 : vector<8x128xi32>
    %7 = arith.extui %6 : vector<8x128xi1> to vector<8x128xi32>
    %8 = arith.sitofp %7 : vector<8x128xi32> to vector<8x128xf32>
    %9 = arith.addf %1, %8 : vector<8x128xf32>
    %c0_1 = arith.constant 0 : index
    %c1 = arith.constant 1 : index
    %10 = vector.load %arg1[%c0_1, %c1] : memref<8x3xi32, #tpu.memory_space<vmem>>, vector<8x1xi32>
    %c10_i32 = arith.constant 10 : i32
    %11 = vector.broadcast %c10_i32 : i32 to vector<8x1xi32>
    %12 = arith.addi %10, %11 : vector<8x1xi32>
    %13 = vector.broadcast %12 : vector<8x1xi32> to vector<8x128xi32>
    %14 = arith.cmpi eq, %13, %0 : vector<8x128xi32>
    %15 = arith.extui %14 : vector<8x128xi1> to vector<8x128xi32>
    %16 = arith.sitofp %15 : vector<8x128xi32> to vector<8x128xf32>
    %17 = arith.addf %9, %16 : vector<8x128xf32>
    %c0_2 = arith.constant 0 : index
    %c2 = arith.constant 2 : index
    %18 = vector.load %arg1[%c0_2, %c2] : memref<8x3xi32, #tpu.memory_space<vmem>>, vector<8x1xi32>
    %c22_i32 = arith.constant 22 : i32
    %19 = vector.broadcast %c22_i32 : i32 to vector<8x1xi32>
    %20 = arith.addi %18, %19 : vector<8x1xi32>
    %21 = vector.broadcast %20 : vector<8x1xi32> to vector<8x128xi32>
    %22 = arith.cmpi eq, %21, %0 : vector<8x128xi32>
    %23 = arith.extui %22 : vector<8x128xi1> to vector<8x128xi32>
    %24 = arith.sitofp %23 : vector<8x128xi32> to vector<8x128xf32>
    %25 = arith.addf %17, %24 : vector<8x128xf32>
    %c0_3 = arith.constant 0 : index
    %c0_4 = arith.constant 0 : index
    %26 = vector.load %arg2[%c0_3, %c0_4] : memref<128x128xf32, #tpu.memory_space<vmem>>, vector<128x128xf32>
    %cst_5 = arith.constant dense<0.000000e+00> : vector<8x128xf32>
    %27 = tpu.matmul %25, %26, %cst_5 {dimension_numbers = #tpu.dot_dimension_numbers<[1], [0], [0], [1], [0, 0, 1, 1], [], []>} : vector<8x128xf32>, vector<128x128xf32>, vector<8x128xf32> -> vector<8x128xf32>
    %c0_6 = arith.constant 0 : index
    %c0_7 = arith.constant 0 : index
    %28 = vector.load %arg3[%c0_6, %c0_7] : memref<128x128xf32, #tpu.memory_space<vmem>>, vector<128x128xf32>
    %cst_8 = arith.constant dense<0.000000e+00> : vector<8x128xf32>
    %29 = tpu.matmul %27, %28, %cst_8 {dimension_numbers = #tpu.dot_dimension_numbers<[1], [0], [0], [1], [0, 0, 1, 1], [], []>} : vector<8x128xf32>, vector<128x128xf32>, vector<8x128xf32> -> vector<8x128xf32>
    %c0_9 = arith.constant 0 : index
    %c0_10 = arith.constant 0 : index
    %c0_11 = arith.constant 0 : index
    %30 = vector.load %arg6[%c0_9, %c0_10, %c0_11] : memref<3x3x128xf32, #tpu.memory_space<vmem>>, vector<1x1x128xf32>
    %31 = vector.shape_cast %30 : vector<1x1x128xf32> to vector<1x128xf32>
    %32 = vector.broadcast %31 : vector<1x128xf32> to vector<8x128xf32>
    %33 = arith.addf %29, %32 : vector<8x128xf32>
    %cst_12 = arith.constant 0.000000e+00 : f32
    %34 = vector.broadcast %cst_12 : f32 to vector<8x128xf32>
    %35 = arith.maximumf %33, %34 : vector<8x128xf32>
    %c0_13 = arith.constant 0 : index
    %c1_14 = arith.constant 1 : index
    %c0_15 = arith.constant 0 : index
    %36 = vector.load %arg6[%c0_13, %c1_14, %c0_15] : memref<3x3x128xf32, #tpu.memory_space<vmem>>, vector<1x1x128xf32>
    %37 = vector.shape_cast %36 : vector<1x1x128xf32> to vector<1x128xf32>
    %38 = vector.broadcast %37 : vector<1x128xf32> to vector<8x128xf32>
    %39 = arith.mulf %35, %38 : vector<8x128xf32>
    %c0_16 = arith.constant 0 : index
    %c2_17 = arith.constant 2 : index
    %c0_18 = arith.constant 0 : index
    %40 = vector.load %arg6[%c0_16, %c2_17, %c0_18] : memref<3x3x128xf32, #tpu.memory_space<vmem>>, vector<1x1x128xf32>
    %41 = vector.shape_cast %40 : vector<1x1x128xf32> to vector<1x128xf32>
    %42 = vector.broadcast %41 : vector<1x128xf32> to vector<8x128xf32>
    %43 = arith.addf %39, %42 : vector<8x128xf32>
    %c0_19 = arith.constant 0 : index
    %c0_20 = arith.constant 0 : index
    %44 = vector.load %arg4[%c0_19, %c0_20] : memref<128x128xf32, #tpu.memory_space<vmem>>, vector<128x128xf32>
    %cst_21 = arith.constant dense<0.000000e+00> : vector<8x128xf32>
    %45 = tpu.matmul %43, %44, %cst_21 {dimension_numbers = #tpu.dot_dimension_numbers<[1], [0], [0], [1], [0, 0, 1, 1], [], []>} : vector<8x128xf32>, vector<128x128xf32>, vector<8x128xf32> -> vector<8x128xf32>
    %c1_22 = arith.constant 1 : index
    %c0_23 = arith.constant 0 : index
    %c0_24 = arith.constant 0 : index
    %46 = vector.load %arg6[%c1_22, %c0_23, %c0_24] : memref<3x3x128xf32, #tpu.memory_space<vmem>>, vector<1x1x128xf32>
    %47 = vector.shape_cast %46 : vector<1x1x128xf32> to vector<1x128xf32>
    %48 = vector.broadcast %47 : vector<1x128xf32> to vector<8x128xf32>
    %49 = arith.addf %45, %48 : vector<8x128xf32>
    %cst_25 = arith.constant 0.000000e+00 : f32
    %50 = vector.broadcast %cst_25 : f32 to vector<8x128xf32>
    %51 = arith.maximumf %49, %50 : vector<8x128xf32>
    %c1_26 = arith.constant 1 : index
    %c1_27 = arith.constant 1 : index
    %c0_28 = arith.constant 0 : index
    %52 = vector.load %arg6[%c1_26, %c1_27, %c0_28] : memref<3x3x128xf32, #tpu.memory_space<vmem>>, vector<1x1x128xf32>
    %53 = vector.shape_cast %52 : vector<1x1x128xf32> to vector<1x128xf32>
    %54 = vector.broadcast %53 : vector<1x128xf32> to vector<8x128xf32>
    %55 = arith.mulf %51, %54 : vector<8x128xf32>
    %c1_29 = arith.constant 1 : index
    %c2_30 = arith.constant 2 : index
    %c0_31 = arith.constant 0 : index
    %56 = vector.load %arg6[%c1_29, %c2_30, %c0_31] : memref<3x3x128xf32, #tpu.memory_space<vmem>>, vector<1x1x128xf32>
    %57 = vector.shape_cast %56 : vector<1x1x128xf32> to vector<1x128xf32>
    %58 = vector.broadcast %57 : vector<1x128xf32> to vector<8x128xf32>
    %59 = arith.addf %55, %58 : vector<8x128xf32>
    %c0_32 = arith.constant 0 : index
    %c0_33 = arith.constant 0 : index
    %60 = vector.load %arg5[%c0_32, %c0_33] : memref<128x128xf32, #tpu.memory_space<vmem>>, vector<128x128xf32>
    %cst_34 = arith.constant dense<0.000000e+00> : vector<8x128xf32>
    %61 = tpu.matmul %59, %60, %cst_34 {dimension_numbers = #tpu.dot_dimension_numbers<[1], [0], [0], [1], [0, 0, 1, 1], [], []>} : vector<8x128xf32>, vector<128x128xf32>, vector<8x128xf32> -> vector<8x128xf32>
    %c2_35 = arith.constant 2 : index
    %c0_36 = arith.constant 0 : index
    %c0_37 = arith.constant 0 : index
    %62 = vector.load %arg6[%c2_35, %c0_36, %c0_37] : memref<3x3x128xf32, #tpu.memory_space<vmem>>, vector<1x1x128xf32>
    %63 = vector.shape_cast %62 : vector<1x1x128xf32> to vector<1x128xf32>
    %64 = vector.broadcast %63 : vector<1x128xf32> to vector<8x128xf32>
    %65 = arith.addf %61, %64 : vector<8x128xf32>
    %c0_38 = arith.constant 0 : index
    %c0_39 = arith.constant 0 : index
    %66 = vector.load %arg7[%c0_38, %c0_39] : memref<8x128xf32, #tpu.memory_space<vmem>>, vector<8x128xf32>
    tpu.vector_store %arg7[%c0_38, %c0_39], %65 {strides = array<i32>} : memref<8x128xf32, #tpu.memory_space<vmem>>, vector<8x128xf32>,
    return
  }
  func.func @transform_0(%arg0: i32) -> (i32, i32) {
    %c0_i32 = arith.constant 0 : i32
    %c0_i32_0 = arith.constant 0 : i32
    return %arg0, %c0_i32 : i32, i32
  }
  func.func @transform_1(%arg0: i32) -> (i32, i32) {
    %c0_i32 = arith.constant 0 : i32
    %c0_i32_0 = arith.constant 0 : i32
    %c0_i32_1 = arith.constant 0 : i32
    return %c0_i32, %c0_i32_0 : i32, i32
  }
  func.func @transform_2(%arg0: i32) -> (i32, i32) {
    %c0_i32 = arith.constant 0 : i32
    %c0_i32_0 = arith.constant 0 : i32
    %c0_i32_1 = arith.constant 0 : i32
    return %c0_i32, %c0_i32_0 : i32, i32
  }
  func.func @transform_3(%arg0: i32) -> (i32, i32) {
    %c0_i32 = arith.constant 0 : i32
    %c0_i32_0 = arith.constant 0 : i32
    %c0_i32_1 = arith.constant 0 : i32
    return %c0_i32, %c0_i32_0 : i32, i32
  }
  func.func @transform_4(%arg0: i32) -> (i32, i32) {
    %c0_i32 = arith.constant 0 : i32
    %c0_i32_0 = arith.constant 0 : i32
    %c0_i32_1 = arith.constant 0 : i32
    return %c0_i32, %c0_i32_0 : i32, i32
  }
  func.func @transform_5(%arg0: i32) -> (i32, i32, i32) {
    %c0_i32 = arith.constant 0 : i32
    %c0_i32_0 = arith.constant 0 : i32
    %c0_i32_1 = arith.constant 0 : i32
    %c0_i32_2 = arith.constant 0 : i32
    return %c0_i32, %c0_i32_0, %c0_i32_1 : i32, i32, i32
  }
  func.func @transform_6(%arg0: i32) -> (i32, i32) {
    %c0_i32 = arith.constant 0 : i32
    %c0_i32_0 = arith.constant 0 : i32
    return %arg0, %c0_i32 : i32, i32
  }
}

</mosaic_0001>

<bundles_post_ra>
// kernel: tpu_custom_call.1
= control target key start
LH: loop header
LB: loop body
LE: loop exit
PB: predicated region body
PF: predicated region fallthrough
CT: control target
= control target key end

     0   :  { %11 = vsyncpa [#allocation3], 0  ;;  %s1031_s0 = inlined_call_operand.vmem [shape: s32[8,3], index: 0, kind: input, shape index: {}]   ;;  %s1032_s1 = inlined_call_operand.hbm [shape: f32[128,128], index: 1, kind: input, shape index: {}]   ;;  %s1033_s2 = inlined_call_operand.hbm [shape: f32[128,128], index: 2, kind: input, shape index: {}]   ;;  %s1034_s3 = inlined_call_operand.hbm [shape: f32[128,128], index: 3, kind: input, shape index: {}]   ;;  %s1035_s4 = inlined_call_operand.hbm [shape: f32[128,128], index: 4, kind: input, shape index: {}]   ;;  %s1036_s5 = inlined_call_operand.vmem [shape: f32[3,3,128], index: 5, kind: input, shape index: {}]   ;;  %s1037_s6 = inlined_call_operand.hbm [shape: f32[8,128], index: 6, kind: output, shape index: {}]  }
   0x1   :  { %12 = vsyncpa [#allocation6], 0 }
   0x2   :  { %13 = vsyncpa [#allocation9], 0 }
   0x3   :  { %14 = vsyncpa [#allocation4], 0  ;;  %s856_s21 = smov [#allocation5]   ;;  %s857_s23 = smov [#allocation2]  }
   0x4   :  { %s34_s22 = sshll.u32 %s856_s21, 4  ;;  %s22_s24 = sshll.u32 %s857_s23, 4  ;;  %s35_s22 = int_to_ptr.vmem [resolvable:$true] %s34_s22  ;;  %s23_s24 = int_to_ptr.vmem [resolvable:$true] %s22_s24 }
   0x5   :  { %s756_s25 = scalar_lea.vmem %s35_s22, 2048  ;;  %p761_p1 = scmp.lt.s32.totalorder %s35_s22, %s35_s22 }
   0x6   :  { %p757_p0 = scmp.ne.s32.totalorder %s35_s22, %s756_s25  ;;  %p762_p2 = scmp.lt.s32.totalorder %s756_s25, %s756_s25 }
   0x8   :  { %p763_p3 = por %p762_p2, %p761_p1 }
   0xa   :  { %p764_p4 = pnand %p763_p3, %p757_p0 }
   0xc   :  { %767 = shalt.err (!%p764_p4)
}
   0xd   :  { %s858_s26 = smov 128   ;;  %s859_s27 = smov 8  }
   0xe   :  { %40 = dma.hbm_to_vmem [thread:$0]  %s1033_s2, 2048, %s35_s22, [#allocation6], %s858_s26, %s858_s26, %s859_s27  }
   0xf   :  { %s776_s30 = scalar_lea.vmem %s23_s24, 2048  ;;  %p781_p6 = scmp.lt.s32.totalorder %s23_s24, %s23_s24 }
  0x10   :  { %p777_p5 = scmp.ne.s32.totalorder %s23_s24, %s776_s30  ;;  %p782_p7 = scmp.lt.s32.totalorder %s776_s30, %s776_s30 }
  0x12   :  { %p783_p8 = por %p782_p7, %p781_p6 }
  0x14   :  { %p784_p9 = pnand %p783_p8, %p777_p5 }
  0x16   :  { %787 = shalt.err (!%p784_p9)
}
  0x17   :  { %28 = dma.hbm_to_vmem [thread:$0]  %s1032_s1, 2048, %s23_s24, [#allocation3], %s858_s26, %s858_s26, %s859_s27  }
  0x18   :  { %s860_s9 = smov [#allocation7]   ;;  %s861_s11 = smov [#allocation8]  }
  0x19   :  { %s46_s10 = sshll.u32 %s860_s9, 4  ;;  %s58_s12 = sshll.u32 %s861_s11, 4  ;;  %s47_s10 = int_to_ptr.vmem [resolvable:$true] %s46_s10  ;;  %s59_s12 = int_to_ptr.vmem [resolvable:$true] %s58_s12 }
  0x1a   :  { %s796_s2 = scalar_lea.vmem %s47_s10, 2048  ;;  %p801_p11 = scmp.lt.s32.totalorder %s47_s10, %s47_s10 }
  0x1b   :  { %p797_p10 = scmp.ne.s32.totalorder %s47_s10, %s796_s2  ;;  %p802_p12 = scmp.lt.s32.totalorder %s796_s2, %s796_s2 }
  0x1d   :  { %p803_p13 = por %p802_p12, %p801_p11 }
  0x1f   :  { %p804_p0 = pnand %p803_p13, %p797_p10 }
  0x21   :  { %807 = shalt.err (!%p804_p0)
}
  0x22   :  { %52 = dma.hbm_to_vmem [thread:$0]  %s1034_s3, 2048, %s47_s10, [#allocation6], %s858_s26, %s858_s26, %s859_s27  }
  0x23   :  { %s816_s1 = scalar_lea.vmem %s59_s12, 2048  ;;  %p821_p2 = scmp.lt.s32.totalorder %s59_s12, %s59_s12 }
  0x24   :  { %p817_p1 = scmp.ne.s32.totalorder %s59_s12, %s816_s1  ;;  %p822_p3 = scmp.lt.s32.totalorder %s816_s1, %s816_s1 }
  0x26   :  { %p823_p4 = por %p822_p3, %p821_p2 }
  0x28   :  { %p824_p5 = pnand %p823_p4, %p817_p1 }
  0x2a   :  { %827 = shalt.err (!%p824_p5)
}
  0x2b   :  { %64 = dma.hbm_to_vmem [thread:$0]  %s1035_s4, 2048, %s59_s12, [#allocation9], %s858_s26, %s858_s26, %s859_s27  }
  0x2c   :  { %848 = dma.done.wait [#allocation3], 2048  }
  0x2d   :  { %849 = vsyncadd [#allocation3], 4294965248 }
  0x2e   :  { %850 = dma.done.wait [#allocation6], 4096  }
  0x2f   :  { %851 = vsyncadd [#allocation6], 4294963200 }
  0x30   :  { %852 = dma.done.wait [#allocation9], 2048  }
  0x31   :  { %853 = vsyncadd [#allocation9], 4294965248  ;;  %v862_v0 = vmov 0   ;;  %v863_v1 = vmov 2   ;;  %v864_v2 = vmov 0.0   ;;  %v81_v3 = vld [vmem:[%s1031_s0] sm:$0xff]  ;;  %v79_v38 = vlaneseq }
  0x32   :  { %744 = vset.pattern.permute.xlu0 %v862_v0  ;;  %746 = vset.pattern.permute.xlu1 %v863_v1  ;;  %v120_v4 = vld [vmem:[#allocation2 + $0x78] sm:$0xff]  ;;  %v119_v5 = vld [vmem:[#allocation2 + $0x70] sm:$0xff]  ;;  %v97_v6 = vadd.s32 22, %v81_v3  ;;  %v89_v7 = vadd.s32 10, %v81_v3  ;;  %v118_v8 = vld [vmem:[#allocation2 + $0x68] sm:$0xff]  ;;  %v865_v10 = vmov 1  }
  0x33   :  { %592 = vmatprep.subr.mxu0 %v864_v2  ;;  %627 = vmatprep.subr.mxu1 %v864_v2  ;;  %v117_v9 = vld [vmem:[#allocation2 + $0x60] sm:$0xff]  ;;  %v116_v11 = vld [vmem:[#allocation2 + $0x58] sm:$0xff]  ;;  %vm866_vm0 = vmmov 0   ;;  %v115_v12 = vld [vmem:[#allocation2 + $0x50] sm:$0xff]  ;;  %v80_v39 = vand.u32 127, %v79_v38  ;;  %s867_s30 = smov [#allocation10]  }
  0x34   :  { %83 = vperm.xlu0 %744, %v81_v3   ;;  %593 = vmatpush3.msra.mxu0 %v120_v4  ;;  %v206_v13 = vld [vmem:[#allocation5 + $0x78] sm:$0xff]  ;;  %v205_v14 = vld [vmem:[#allocation5 + $0x70] sm:$0xff]  ;;  %v114_v15 = vld [vmem:[#allocation2 + $0x48] sm:$0xff]  ;;  %s499_s7 = sshll.u32 %s867_s30, 4  ;;  %s500_s7 = int_to_ptr.vmem [resolvable:$true] %s499_s7 }
  0x35   :  { %594 = vmatprep.subr.mxu0 %v864_v2  ;;  %99 = vperm.xlu1 %746, %v97_v6   ;;  %v204_v16 = vld [vmem:[#allocation5 + $0x68] sm:$0xff]  ;;  %v113_v17 = vld [vmem:[#allocation2 + $0x40] sm:$0xff]  ;;  %v112_v19 = vld [vmem:[#allocation2 + $0x38] sm:$0xff]  ;;  %s828_s8 = scalar_lea.vmem %s500_s7, 128  ;;  %p833_p7 = scmp.lt.s32.totalorder %s500_s7, %s500_s7 }
  0x36   :  { %595 = vmatpush3.msra.mxu0 %v119_v5  ;;  %624 = vmatprep.mubr.msk.f32.mxu0 %vm866_vm0, %v864_v2  ;;  %v203_v18 = vld [vmem:[#allocation5 + $0x60] sm:$0xff]  ;;  %v202_v20 = vld [vmem:[#allocation5 + $0x58] sm:$0xff]  ;;  %v111_v21 = vld [vmem:[#allocation2 + $0x30] sm:$0xff]  ;;  %p829_p6 = scmp.ne.s32.totalorder %s500_s7, %s828_s8  ;;  %p834_p8 = scmp.lt.s32.totalorder %s828_s8, %s828_s8 }
  0x37   :  { %596 = vmatprep.subr.mxu0 %v864_v2  ;;  %659 = vmatprep.mubr.msk.f32.mxu1 %vm866_vm0, %v864_v2  ;;  %v201_v22 = vld [vmem:[#allocation5 + $0x50] sm:$0xff]  ;;  %v110_v23 = vld [vmem:[#allocation2 + $0x28] sm:$0xff]  ;;  %v109_v25 = vld [vmem:[#allocation2 + $0x20] sm:$0xff] }
  0x38   :  { %745 = vset.pattern.permute.xlu0 %v865_v10  ;;  %597 = vmatpush3.msra.mxu0 %v118_v8  ;;  %v200_v24 = vld [vmem:[#allocation5 + $0x48] sm:$0xff]  ;;  %v199_v26 = vld [vmem:[#allocation5 + $0x40] sm:$0xff]  ;;  %v108_v27 = vld [vmem:[#allocation2 + $0x18] sm:$0xff]  ;;  %p835_p9 = por %p834_p8, %p833_p7 }
  0x39   :  { %91 = vperm.xlu0 %745, %v89_v7   ;;  %598 = vmatprep.subr.mxu0 %v864_v2  ;;  %v198_v28 = vld [vmem:[#allocation5 + $0x38] sm:$0xff]  ;;  %v107_v29 = vld [vmem:[#allocation2 + $0x10] sm:$0xff]  ;;  %v106_v31 = vld [vmem:[#allocation2 + $0x8] sm:$0xff] }
  0x3a   :  { %599 = vmatpush3.msra.mxu0 %v117_v9  ;;  %628 = vmatpush3.msra.mxu1 %v206_v13  ;;  %v197_v30 = vld [vmem:[#allocation5 + $0x30] sm:$0xff]  ;;  %v196_v32 = vld [vmem:[#allocation5 + $0x28] sm:$0xff]  ;;  %v105_v33 = vld [vmem:[#allocation2] sm:$0xff]  ;;  %p836_p10 = pnand %p835_p9, %p829_p6 }
  0x3b   :  { %600 = vmatprep.subr.mxu0 %v864_v2  ;;  %629 = vmatprep.subr.mxu1 %v864_v2  ;;  %v195_v34 = vld [vmem:[#allocation5 + $0x20] sm:$0xff]  ;;  %v194_v35 = vld [vmem:[#allocation5 + $0x18] sm:$0xff]  ;;  %v193_v36 = vld [vmem:[#allocation5 + $0x10] sm:$0xff] }
  0x3c   :  { %601 = vmatpush3.msra.mxu0 %v116_v11  ;;  %630 = vmatpush3.msra.mxu1 %v205_v14  ;;  %v192_v37 = vld [vmem:[#allocation5 + $0x8] sm:$0xff]  ;;  %v191_v48 = vld [vmem:[#allocation5] sm:$0xff]  ;;  %v310_v49 = vld [vmem:[#allocation7 + $0x78] sm:$0xff] }
  0x3d   :  { %602 = vmatprep.subr.mxu0 %v864_v2  ;;  %631 = vmatprep.subr.mxu1 %v864_v2  ;;  %v309_v50 = vld [vmem:[#allocation7 + $0x70] sm:$0xff]  ;;  %v308_v51 = vld [vmem:[#allocation7 + $0x68] sm:$0xff]  ;;  %v307_v52 = vld [vmem:[#allocation7 + $0x60] sm:$0xff] }
  0x3e   :  { %603 = vmatpush3.msra.mxu0 %v115_v12  ;;  %632 = vmatpush3.msra.mxu1 %v204_v16  ;;  %v306_v53 = vld [vmem:[#allocation7 + $0x58] sm:$0xff]  ;;  %v305_v54 = vld [vmem:[#allocation7 + $0x50] sm:$0xff]  ;;  %v304_v55 = vld [vmem:[#allocation7 + $0x48] sm:$0xff] }
  0x3f   :  { %604 = vmatprep.subr.mxu0 %v864_v2  ;;  %633 = vmatprep.subr.mxu1 %v864_v2  ;;  %v303_v56 = vld [vmem:[#allocation7 + $0x40] sm:$0xff]  ;;  %v302_v57 = vld [vmem:[#allocation7 + $0x38] sm:$0xff]  ;;  %v301_v58 = vld [vmem:[#allocation7 + $0x30] sm:$0xff] }
  0x40   :  { %605 = vmatpush3.msra.mxu0 %v114_v15  ;;  %634 = vmatpush3.msra.mxu1 %v203_v18  ;;  %v300_v59 = vld [vmem:[#allocation7 + $0x28] sm:$0xff]  ;;  %v299_v62 = vld [vmem:[#allocation7 + $0x20] sm:$0xff]  ;;  %v298_v63 = vld [vmem:[#allocation7 + $0x18] sm:$0xff] }
  0x41   :  { %606 = vmatprep.subr.mxu0 %v864_v2  ;;  %635 = vmatprep.subr.mxu1 %v864_v2  ;;  %v297_v0 = vld [vmem:[#allocation7 + $0x10] sm:$0xff]  ;;  %v295_v3 = vld [vmem:[#allocation7] sm:$0xff]  ;;  %v415_v4 = vld [vmem:[#allocation8 + $0x78] sm:$0xff] }
  0x42   :  { %607 = vmatpush3.msra.mxu0 %v113_v17  ;;  %636 = vmatpush3.msra.mxu1 %v202_v20  ;;  %v414_v5 = vld [vmem:[#allocation8 + $0x70] sm:$0xff]  ;;  %v413_v6 = vld [vmem:[#allocation8 + $0x68] sm:$0xff]  ;;  %v412_v7 = vld [vmem:[#allocation8 + $0x60] sm:$0xff] }
  0x43   :  { %608 = vmatprep.subr.mxu0 %v864_v2  ;;  %637 = vmatprep.subr.mxu1 %v864_v2  ;;  %v411_v8 = vld [vmem:[#allocation8 + $0x58] sm:$0xff]  ;;  %v410_v9 = vld [vmem:[#allocation8 + $0x50] sm:$0xff]  ;;  %v409_v10 = vld [vmem:[#allocation8 + $0x48] sm:$0xff] }
  0x44   :  { %609 = vmatpush3.msra.mxu0 %v112_v19  ;;  %638 = vmatpush3.msra.mxu1 %v201_v22  ;;  %v408_v11 = vld [vmem:[#allocation8 + $0x40] sm:$0xff]  ;;  %v407_v12 = vld [vmem:[#allocation8 + $0x38] sm:$0xff]  ;;  %v406_v13 = vld [vmem:[#allocation8 + $0x30] sm:$0xff] }
  0x45   :  { %610 = vmatprep.subr.mxu0 %v864_v2  ;;  %639 = vmatprep.subr.mxu1 %v864_v2  ;;  %v405_v14 = vld [vmem:[#allocation8 + $0x28] sm:$0xff]  ;;  %v513_v15 = vld [vmem:[%s1036_s5] ss:$0 sm:$0xff]  ;;  %v514_v18 = vld [vmem:[%s1036_s5 + $0x1] ss:$0 sm:$0xff] }
  0x46   :  { %611 = vmatpush3.msra.mxu0 %v111_v21  ;;  %640 = vmatpush3.msra.mxu1 %v200_v24  ;;  %v515_v21 = vld [vmem:[%s1036_s5 + $0x2] ss:$0 sm:$0xff]  ;;  %v404_v24 = vld [vmem:[#allocation8 + $0x20] sm:$0xff] }
  0x47   :  { %612 = vmatprep.subr.mxu0 %v864_v2  ;;  %641 = vmatprep.subr.mxu1 %v864_v2 }
  0x48   :  { %613 = vmatpush3.msra.mxu0 %v110_v23  ;;  %642 = vmatpush3.msra.mxu1 %v199_v26  ;;  %v402_v26 = vld [vmem:[#allocation8 + $0x10] sm:$0xff] }
  0x49   :  { %614 = vmatprep.subr.mxu0 %v864_v2  ;;  %643 = vmatprep.subr.mxu1 %v864_v2 }
  0x4a   :  { %615 = vmatpush3.msra.mxu0 %v109_v25  ;;  %644 = vmatpush3.msra.mxu1 %v198_v28  ;;  %v403_v25 = vld [vmem:[#allocation8 + $0x18] sm:$0xff]  ;;  %v400_v28 = vld [vmem:[#allocation8] sm:$0xff] }
  0x4b   :  { %616 = vmatprep.subr.mxu0 %v864_v2  ;;  %645 = vmatprep.subr.mxu1 %v864_v2 }
  0x4c   :  { %617 = vmatpush3.msra.mxu0 %v108_v27  ;;  %646 = vmatpush3.msra.mxu1 %v197_v30  ;;  %v401_v27 = vld [vmem:[#allocation8 + $0x8] sm:$0xff] }
  0x4d   :  { %618 = vmatprep.subr.mxu0 %v864_v2  ;;  %647 = vmatprep.subr.mxu1 %v864_v2 }
  0x4e   :  { %619 = vmatpush3.msra.mxu0 %v107_v29  ;;  %648 = vmatpush3.msra.mxu1 %v196_v32  ;;  %v517_v29 = vld [vmem:[%s1036_s5 + $0x4] ss:$0 sm:$0xff]  ;;  %v519_v32 = vld [vmem:[%s1036_s5 + $0x5] ss:$0 sm:$0xff] }
  0x4f   :  { %620 = vmatprep.subr.mxu0 %v864_v2  ;;  %649 = vmatprep.subr.mxu1 %v864_v2 }
  0x50   :  { %621 = vmatpush3.msra.mxu0 %v106_v31  ;;  %650 = vmatpush3.msra.mxu1 %v195_v34 }
  0x51   :  { %622 = vmatprep.subr.mxu0 %v864_v2  ;;  %651 = vmatprep.subr.mxu1 %v864_v2 }
  0x52   :  { %623 = vmatpush3.msra.mxu0 %v105_v33  ;;  %652 = vmatpush3.msra.mxu1 %v194_v35  ;;  %v521_v35 = vld [vmem:[%s1036_s5 + $0x6] ss:$0 sm:$0xff] }
  0x53   :  { %662 = vmatprep.subr.mxu0 %v864_v2  ;;  %747 = vset.pattern.permute.xlu0 %v863_v1  ;;  %v296_v1 = vld [vmem:[#allocation7 + $0x8] sm:$0xff] }
  0x54   :  { %653 = vmatprep.subr.mxu1 %v864_v2 }
  0x55   :  { %654 = vmatpush3.msra.mxu1 %v193_v36 }
  0x56   :  { %655 = vmatprep.subr.mxu1 %v864_v2 }
  0x57   :  { %656 = vmatpush3.msra.mxu1 %v192_v37  ;;  %v523_v37 = vld [vmem:[%s1036_s5 + $0x8] ss:$0 sm:$0xff] }
  0x58   :  { %657 = vmatprep.subr.mxu1 %v864_v2 }
  0x59   :  { %658 = vmatpush3.msra.mxu1 %v191_v48 }
  0x5a   :  { %697 = vmatprep.subr.mxu1 %v864_v2 }
  0xaf   :  { %v84_v40 = vpop.permute.xlu0 %83 }
  0xb0   :  { %v100_v41 = vpop.permute.xlu1 %99  ;;  %vm85_vm1 = vcmp.eq.s32.totalorder %v84_v40, %v80_v39 }
  0xb1   :  { %vm101_vm2 = vcmp.eq.s32.totalorder %v100_v41, %v80_v39  ;;  %v510_v43 = vsel %vm85_vm1, 1.0, %v864_v2 }
  0xb2   :  { %v512_v45 = vsel %vm101_vm2, 1.0, %v864_v2 }
  0xb4   :  { %v92_v42 = vpop.permute.xlu0 %91 }
  0xb5   :  { %vm93_vm3 = vcmp.eq.s32.totalorder %v92_v42, %v80_v39 }
  0xb6   :  { %v511_v44 = vsel %vm93_vm3, 1.0, %v864_v2 }
  0xb7   :  { %v96_v46 = vadd.f32 %v511_v44, %v510_v43 }
  0xb9   :  { %v104_v47 = vadd.f32 %v512_v45, %v96_v46 }
  0xbb   :  { %625 = vmatmul.mubr.f32.vlgmr.msra.gmra.mxu0 %v104_v47 }
  0xbc   :  { %694 = vmatprep.mubr.msk.f32.mxu0 %vm866_vm0, %v864_v2  ;;  %663 = vmatpush3.msra.mxu0 %v310_v49 }
  0xbd   :  { %664 = vmatprep.subr.mxu0 %v864_v2 }
  0xbe   :  { %665 = vmatpush3.msra.mxu0 %v309_v50 }
  0xbf   :  { %666 = vmatprep.subr.mxu0 %v864_v2 }
  0xc0   :  { %667 = vmatpush3.msra.mxu0 %v308_v51 }
  0xc1   :  { %668 = vmatprep.subr.mxu0 %v864_v2 }
  0xc2   :  { %669 = vmatpush3.msra.mxu0 %v307_v52 }
  0xc3   :  { %670 = vmatprep.subr.mxu0 %v864_v2 }
  0xc4   :  { %671 = vmatpush3.msra.mxu0 %v306_v53 }
  0xc5   :  { %672 = vmatprep.subr.mxu0 %v864_v2 }
  0xc6   :  { %673 = vmatpush3.msra.mxu0 %v305_v54 }
  0xc7   :  { %674 = vmatprep.subr.mxu0 %v864_v2 }
  0xc8   :  { %675 = vmatpush3.msra.mxu0 %v304_v55 }
  0xc9   :  { %676 = vmatprep.subr.mxu0 %v864_v2 }
  0xca   :  { %677 = vmatpush3.msra.mxu0 %v303_v56 }
  0xcb   :  { %678 = vmatprep.subr.mxu0 %v864_v2 }
  0xcc   :  { %679 = vmatpush3.msra.mxu0 %v302_v57 }
  0xcd   :  { %680 = vmatprep.subr.mxu0 %v864_v2 }
  0xce   :  { %681 = vmatpush3.msra.mxu0 %v301_v58 }
  0xcf   :  { %682 = vmatprep.subr.mxu0 %v864_v2 }
  0xd0   :  { %683 = vmatpush3.msra.mxu0 %v300_v59 }
  0xd1   :  { %684 = vmatprep.subr.mxu0 %v864_v2 }
  0xd2   :  { %685 = vmatpush3.msra.mxu0 %v299_v62 }
  0xd3   :  { %686 = vmatprep.subr.mxu0 %v864_v2 }
  0xd4   :  { %687 = vmatpush3.msra.mxu0 %v298_v63 }
  0xd5   :  { %688 = vmatprep.subr.mxu0 %v864_v2 }
  0xd6   :  { %689 = vmatpush3.msra.mxu0 %v297_v0 }
  0xd7   :  { %690 = vmatprep.subr.mxu0 %v864_v2 }
  0xd8   :  { %691 = vmatpush3.msra.mxu0 %v296_v1 }
  0xd9   :  { %692 = vmatprep.subr.mxu0 %v864_v2 }
  0xda   :  { %693 = vmatpush3.msra.mxu0 %v295_v3 }
 0x17b   :  { %v187_v60 = vpop.f32.mrf.mxu0 }
 0x17c   :  { %660 = vmatmul.mubr.f32.vlgmr.msra.gmra.mxu1 %v187_v60 }
 0x17d   :  { %v626_v61 = vpop.f32.mrf.mxu0  ;;  %729 = vmatprep.mubr.msk.f32.mxu1 %vm866_vm0, %v864_v2  ;;  %698 = vmatpush3.msra.mxu1 %v415_v4 }
 0x17e   :  { %699 = vmatprep.subr.mxu1 %v864_v2 }
 0x17f   :  { %700 = vmatpush3.msra.mxu1 %v414_v5 }
 0x180   :  { %701 = vmatprep.subr.mxu1 %v864_v2 }
 0x181   :  { %702 = vmatpush3.msra.mxu1 %v413_v6 }
 0x182   :  { %703 = vmatprep.subr.mxu1 %v864_v2 }
 0x183   :  { %704 = vmatpush3.msra.mxu1 %v412_v7 }
 0x184   :  { %705 = vmatprep.subr.mxu1 %v864_v2 }
 0x185   :  { %706 = vmatpush3.msra.mxu1 %v411_v8 }
 0x186   :  { %707 = vmatprep.subr.mxu1 %v864_v2 }
 0x187   :  { %708 = vmatpush3.msra.mxu1 %v410_v9 }
 0x188   :  { %709 = vmatprep.subr.mxu1 %v864_v2 }
 0x189   :  { %710 = vmatpush3.msra.mxu1 %v409_v10 }
 0x18a   :  { %711 = vmatprep.subr.mxu1 %v864_v2 }
 0x18b   :  { %712 = vmatpush3.msra.mxu1 %v408_v11 }
 0x18c   :  { %713 = vmatprep.subr.mxu1 %v864_v2 }
 0x18d   :  { %714 = vmatpush3.msra.mxu1 %v407_v12 }
 0x18e   :  { %715 = vmatprep.subr.mxu1 %v864_v2 }
 0x18f   :  { %716 = vmatpush3.msra.mxu1 %v406_v13 }
 0x190   :  { %717 = vmatprep.subr.mxu1 %v864_v2 }
 0x191   :  { %718 = vmatpush3.msra.mxu1 %v405_v14 }
 0x192   :  { %719 = vmatprep.subr.mxu1 %v864_v2 }
 0x193   :  { %720 = vmatpush3.msra.mxu1 %v404_v24 }
 0x194   :  { %721 = vmatprep.subr.mxu1 %v864_v2 }
 0x195   :  { %722 = vmatpush3.msra.mxu1 %v403_v25 }
 0x196   :  { %723 = vmatprep.subr.mxu1 %v864_v2 }
 0x197   :  { %724 = vmatpush3.msra.mxu1 %v402_v26 }
 0x198   :  { %725 = vmatprep.subr.mxu1 %v864_v2 }
 0x199   :  { %726 = vmatpush3.msra.mxu1 %v401_v27 }
 0x19a   :  { %727 = vmatprep.subr.mxu1 %v864_v2 }
 0x19b   :  { %728 = vmatpush3.msra.mxu1 %v400_v28 }
 0x23c   :  { %v278_v16 = vpop.f32.mrf.mxu1 }
 0x23d   :  { %v279_v17 = vadd.f32 %v513_v15, %v278_v16 }
 0x23e   :  { %v661_v19 = vpop.f32.mrf.mxu1 }
 0x23f   :  { %v282_v20 = vmax.f32 %v279_v17, 0.0 }
 0x241   :  { %v288_v22 = vmul.f32 %v514_v18, %v282_v20 }
 0x243   :  { %v294_v23 = vadd.f32 %v515_v21, %v288_v22 }
 0x245   :  { %695 = vmatmul.mubr.f32.vlgmr.msra.gmra.mxu0 %v294_v23 }
 0x305   :  { %v383_v30 = vpop.f32.mrf.mxu0 }
 0x306   :  { %v384_v31 = vadd.f32 %v517_v29, %v383_v30 }
 0x307   :  { %v696_v33 = vpop.f32.mrf.mxu0 }
 0x308   :  { %v387_v34 = vmax.f32 %v384_v31, 0.0 }
 0x30a   :  { %v393_v36 = vmul.f32 %v519_v32, %v387_v34 }
 0x30c   :  { %v399_v2 = vadd.f32 %v521_v35, %v393_v36 }
 0x30e   :  { %730 = vmatmul.mubr.f32.vlgmr.msra.gmra.mxu1 %v399_v2 }
 0x3ce   :  { %v488_v38 = vpop.f32.mrf.mxu1 }
 0x3cf   :  { %v489_v39 = vadd.f32 %v523_v37, %v488_v38 }
 0x3d0   :  { %v731_v40 = vpop.f32.mrf.mxu1 }
 0x3d1   :  { %492 = vst [vmem:[#allocation10] sm:$0xff] %v489_v39 }
 0x3d2   :  { %839 = shalt.err (!%p836_p10)
}
 0x3d3   :  { %502 = dma.vmem_to_hbm [thread:$0]  %s500_s7, 128, %s1037_s6, [#allocation4]  }
 0x3d4   :  { %854 = dma.done.wait [#allocation4], 128  }
 0x3d5   :  { %855 = vsyncadd [#allocation4], 4294967168 }
 0x3d6   :  { %506 = vsyncpa [#allocation3], 1 }
 0x3d7   :  { %507 = vsyncpa [#allocation6], 1 }
 0x3d8   :  { %508 = vsyncpa [#allocation9], 1 }
 0x3d9   :  { %509 = vsyncpa [#allocation4], 1 }

// kernel: tpu_custom_call.1
= control target key start
LH: loop header
LB: loop body
LE: loop exit
PB: predicated region body
PF: predicated region fallthrough
CT: control target
= control target key end

     0   :  { %11 = vsyncpa [#allocation3], 0  ;;  %s1031_s0 = inlined_call_operand.vmem [shape: s32[8,3], index: 0, kind: input, shape index: {}]   ;;  %s1032_s1 = inlined_call_operand.hbm [shape: f32[128,128], index: 1, kind: input, shape index: {}]   ;;  %s1033_s2 = inlined_call_operand.hbm [shape: f32[128,128], index: 2, kind: input, shape index: {}]   ;;  %s1034_s3 = inlined_call_operand.hbm [shape: f32[128,128], index: 3, kind: input, shape index: {}]   ;;  %s1035_s4 = inlined_call_operand.hbm [shape: f32[128,128], index: 4, kind: input, shape index: {}]   ;;  %s1036_s5 = inlined_call_operand.vmem [shape: f32[3,3,128], index: 5, kind: input, shape index: {}]   ;;  %s1037_s6 = inlined_call_operand.hbm [shape: f32[8,128], index: 6, kind: output, shape index: {}]  }
   0x1   :  { %12 = vsyncpa [#allocation6], 0 }
   0x2   :  { %13 = vsyncpa [#allocation9], 0 }
   0x3   :  { %14 = vsyncpa [#allocation4], 0  ;;  %s856_s21 = smov [#allocation5]   ;;  %s857_s23 = smov [#allocation2]  }
   0x4   :  { %s34_s22 = sshll.u32 %s856_s21, 4  ;;  %s22_s24 = sshll.u32 %s857_s23, 4  ;;  %s35_s22 = int_to_ptr.vmem [resolvable:$true] %s34_s22  ;;  %s23_s24 = int_to_ptr.vmem [resolvable:$true] %s22_s24 }
   0x5   :  { %s756_s25 = scalar_lea.vmem %s35_s22, 2048  ;;  %p761_p1 = scmp.lt.s32.totalorder %s35_s22, %s35_s22 }
   0x6   :  { %p757_p0 = scmp.ne.s32.totalorder %s35_s22, %s756_s25  ;;  %p762_p2 = scmp.lt.s32.totalorder %s756_s25, %s756_s25 }
   0x8   :  { %p763_p3 = por %p762_p2, %p761_p1 }
   0xa   :  { %p764_p4 = pnand %p763_p3, %p757_p0 }
   0xc   :  { %767 = shalt.err (!%p764_p4)
}
   0xd   :  { %s858_s26 = smov 128   ;;  %s859_s27 = smov 8  }
   0xe   :  { %40 = dma.hbm_to_vmem [thread:$0]  %s1033_s2, 2048, %s35_s22, [#allocation6], %s858_s26, %s858_s26, %s859_s27  }
   0xf   :  { %s776_s30 = scalar_lea.vmem %s23_s24, 2048  ;;  %p781_p6 = scmp.lt.s32.totalorder %s23_s24, %s23_s24 }
  0x10   :  { %p777_p5 = scmp.ne.s32.totalorder %s23_s24, %s776_s30  ;;  %p782_p7 = scmp.lt.s32.totalorder %s776_s30, %s776_s30 }
  0x12   :  { %p783_p8 = por %p782_p7, %p781_p6 }
  0x14   :  { %p784_p9 = pnand %p783_p8, %p777_p5 }
  0x16   :  { %787 = shalt.err (!%p784_p9)
}
  0x17   :  { %28 = dma.hbm_to_vmem [thread:$0]  %s1032_s1, 2048, %s23_s24, [#allocation3], %s858_s26, %s858_s26, %s859_s27  }
  0x18   :  { %s860_s9 = smov [#allocation7]   ;;  %s861_s11 = smov [#allocation8]  }
  0x19   :  { %s46_s10 = sshll.u32 %s860_s9, 4  ;;  %s58_s12 = sshll.u32 %s861_s11, 4  ;;  %s47_s10 = int_to_ptr.vmem [resolvable:$true] %s46_s10  ;;  %s59_s12 = int_to_ptr.vmem [resolvable:$true] %s58_s12 }
  0x1a   :  { %s796_s2 = scalar_lea.vmem %s47_s10, 2048  ;;  %p801_p11 = scmp.lt.s32.totalorder %s47_s10, %s47_s10 }
  0x1b   :  { %p797_p10 = scmp.ne.s32.totalorder %s47_s10, %s796_s2  ;;  %p802_p12 = scmp.lt.s32.totalorder %s796_s2, %s796_s2 }
  0x1d   :  { %p803_p13 = por %p802_p12, %p801_p11 }
  0x1f   :  { %p804_p0 = pnand %p803_p13, %p797_p10 }
  0x21   :  { %807 = shalt.err (!%p804_p0)
}
  0x22   :  { %52 = dma.hbm_to_vmem [thread:$0]  %s1034_s3, 2048, %s47_s10, [#allocation6], %s858_s26, %s858_s26, %s859_s27  }
  0x23   :  { %s816_s1 = scalar_lea.vmem %s59_s12, 2048  ;;  %p821_p2 = scmp.lt.s32.totalorder %s59_s12, %s59_s12 }
  0x24   :  { %p817_p1 = scmp.ne.s32.totalorder %s59_s12, %s816_s1  ;;  %p822_p3 = scmp.lt.s32.totalorder %s816_s1, %s816_s1 }
  0x26   :  { %p823_p4 = por %p822_p3, %p821_p2 }
  0x28   :  { %p824_p5 = pnand %p823_p4, %p817_p1 }
  0x2a   :  { %827 = shalt.err (!%p824_p5)
}
  0x2b   :  { %64 = dma.hbm_to_vmem [thread:$0]  %s1035_s4, 2048, %s59_s12, [#allocation9], %s858_s26, %s858_s26, %s859_s27  }
  0x2c   :  { %848 = dma.done.wait [#allocation3], 2048  }
  0x2d   :  { %849 = vsyncadd [#allocation3], 4294965248 }
  0x2e   :  { %850 = dma.done.wait [#allocation6], 4096  }
  0x2f   :  { %851 = vsyncadd [#allocation6], 4294963200 }
  0x30   :  { %852 = dma.done.wait [#allocation9], 2048  }
  0x31   :  { %853 = vsyncadd [#allocation9], 4294965248  ;;  %v862_v0 = vmov 0   ;;  %v863_v1 = vmov 2   ;;  %v864_v2 = vmov 0.0   ;;  %v81_v3 = vld [vmem:[%s1031_s0] sm:$0xff]  ;;  %v79_v38 = vlaneseq }
  0x32   :  { %744 = vset.pattern.permute.xlu0 %v862_v0  ;;  %746 = vset.pattern.permute.xlu1 %v863_v1  ;;  %v120_v4 = vld [vmem:[#allocation2 + $0x78] sm:$0xff]  ;;  %v119_v5 = vld [vmem:[#allocation2 + $0x70] sm:$0xff]  ;;  %v97_v6 = vadd.s32 22, %v81_v3  ;;  %v89_v7 = vadd.s32 10, %v81_v3  ;;  %v118_v8 = vld [vmem:[#allocation2 + $0x68] sm:$0xff]  ;;  %v865_v10 = vmov 1  }
  0x33   :  { %592 = vmatprep.subr.mxu0 %v864_v2  ;;  %627 = vmatprep.subr.mxu1 %v864_v2  ;;  %v117_v9 = vld [vmem:[#allocation2 + $0x60] sm:$0xff]  ;;  %v116_v11 = vld [vmem:[#allocation2 + $0x58] sm:$0xff]  ;;  %vm866_vm0 = vmmov 0   ;;  %v115_v12 = vld [vmem:[#allocation2 + $0x50] sm:$0xff]  ;;  %v80_v39 = vand.u32 127, %v79_v38  ;;  %s867_s30 = smov [#allocation10]  }
  0x34   :  { %83 = vperm.xlu0 %744, %v81_v3   ;;  %593 = vmatpush3.msra.mxu0 %v120_v4  ;;  %v206_v13 = vld [vmem:[#allocation5 + $0x78] sm:$0xff]  ;;  %v205_v14 = vld [vmem:[#allocation5 + $0x70] sm:$0xff]  ;;  %v114_v15 = vld [vmem:[#allocation2 + $0x48] sm:$0xff]  ;;  %s499_s7 = sshll.u32 %s867_s30, 4  ;;  %s500_s7 = int_to_ptr.vmem [resolvable:$true] %s499_s7 }
  0x35   :  { %594 = vmatprep.subr.mxu0 %v864_v2  ;;  %99 = vperm.xlu1 %746, %v97_v6   ;;  %v204_v16 = vld [vmem:[#allocation5 + $0x68] sm:$0xff]  ;;  %v113_v17 = vld [vmem:[#allocation2 + $0x40] sm:$0xff]  ;;  %v112_v19 = vld [vmem:[#allocation2 + $0x38] sm:$0xff]  ;;  %s828_s8 = scalar_lea.vmem %s500_s7, 128  ;;  %p833_p7 = scmp.lt.s32.totalorder %s500_s7, %s500_s7 }
  0x36   :  { %595 = vmatpush3.msra.mxu0 %v119_v5  ;;  %624 = vmatprep.mubr.msk.f32.mxu0 %vm866_vm0, %v864_v2  ;;  %v203_v18 = vld [vmem:[#allocation5 + $0x60] sm:$0xff]  ;;  %v202_v20 = vld [vmem:[#allocation5 + $0x58] sm:$0xff]  ;;  %v111_v21 = vld [vmem:[#allocation2 + $0x30] sm:$0xff]  ;;  %p829_p6 = scmp.ne.s32.totalorder %s500_s7, %s828_s8  ;;  %p834_p8 = scmp.lt.s32.totalorder %s828_s8, %s828_s8 }
  0x37   :  { %596 = vmatprep.subr.mxu0 %v864_v2  ;;  %659 = vmatprep.mubr.msk.f32.mxu1 %vm866_vm0, %v864_v2  ;;  %v201_v22 = vld [vmem:[#allocation5 + $0x50] sm:$0xff]  ;;  %v110_v23 = vld [vmem:[#allocation2 + $0x28] sm:$0xff]  ;;  %v109_v25 = vld [vmem:[#allocation2 + $0x20] sm:$0xff] }
  0x38   :  { %745 = vset.pattern.permute.xlu0 %v865_v10  ;;  %597 = vmatpush3.msra.mxu0 %v118_v8  ;;  %v200_v24 = vld [vmem:[#allocation5 + $0x48] sm:$0xff]  ;;  %v199_v26 = vld [vmem:[#allocation5 + $0x40] sm:$0xff]  ;;  %v108_v27 = vld [vmem:[#allocation2 + $0x18] sm:$0xff]  ;;  %p835_p9 = por %p834_p8, %p833_p7 }
  0x39   :  { %91 = vperm.xlu0 %745, %v89_v7   ;;  %598 = vmatprep.subr.mxu0 %v864_v2  ;;  %v198_v28 = vld [vmem:[#allocation5 + $0x38] sm:$0xff]  ;;  %v107_v29 = vld [vmem:[#allocation2 + $0x10] sm:$0xff]  ;;  %v106_v31 = vld [vmem:[#allocation2 + $0x8] sm:$0xff] }
  0x3a   :  { %599 = vmatpush3.msra.mxu0 %v117_v9  ;;  %628 = vmatpush3.msra.mxu1 %v206_v13  ;;  %v197_v30 = vld [vmem:[#allocation5 + $0x30] sm:$0xff]  ;;  %v196_v32 = vld [vmem:[#allocation5 + $0x28] sm:$0xff]  ;;  %v105_v33 = vld [vmem:[#allocation2] sm:$0xff]  ;;  %p836_p10 = pnand %p835_p9, %p829_p6 }
  0x3b   :  { %600 = vmatprep.subr.mxu0 %v864_v2  ;;  %629 = vmatprep.subr.mxu1 %v864_v2  ;;  %v195_v34 = vld [vmem:[#allocation5 + $0x20] sm:$0xff]  ;;  %v194_v35 = vld [vmem:[#allocation5 + $0x18] sm:$0xff]  ;;  %v193_v36 = vld [vmem:[#allocation5 + $0x10] sm:$0xff] }
  0x3c   :  { %601 = vmatpush3.msra.mxu0 %v116_v11  ;;  %630 = vmatpush3.msra.mxu1 %v205_v14  ;;  %v192_v37 = vld [vmem:[#allocation5 + $0x8] sm:$0xff]  ;;  %v191_v48 = vld [vmem:[#allocation5] sm:$0xff]  ;;  %v310_v49 = vld [vmem:[#allocation7 + $0x78] sm:$0xff] }
  0x3d   :  { %602 = vmatprep.subr.mxu0 %v864_v2  ;;  %631 = vmatprep.subr.mxu1 %v864_v2  ;;  %v309_v50 = vld [vmem:[#allocation7 + $0x70] sm:$0xff]  ;;  %v308_v51 = vld [vmem:[#allocation7 + $0x68] sm:$0xff]  ;;  %v307_v52 = vld [vmem:[#allocation7 + $0x60] sm:$0xff] }
  0x3e   :  { %603 = vmatpush3.msra.mxu0 %v115_v12  ;;  %632 = vmatpush3.msra.mxu1 %v204_v16  ;;  %v306_v53 = vld [vmem:[#allocation7 + $0x58] sm:$0xff]  ;;  %v305_v54 = vld [vmem:[#allocation7 + $0x50] sm:$0xff]  ;;  %v304_v55 = vld [vmem:[#allocation7 + $0x48] sm:$0xff] }
  0x3f   :  { %604 = vmatprep.subr.mxu0 %v864_v2  ;;  %633 = vmatprep.subr.mxu1 %v864_v2  ;;  %v303_v56 = vld [vmem:[#allocation7 + $0x40] sm:$0xff]  ;;  %v302_v57 = vld [vmem:[#allocation7 + $0x38] sm:$0xff]  ;;  %v301_v58 = vld [vmem:[#allocation7 + $0x30] sm:$0xff] }
  0x40   :  { %605 = vmatpush3.msra.mxu0 %v114_v15  ;;  %634 = vmatpush3.msra.mxu1 %v203_v18  ;;  %v300_v59 = vld [vmem:[#allocation7 + $0x28] sm:$0xff]  ;;  %v299_v62 = vld [vmem:[#allocation7 + $0x20] sm:$0xff]  ;;  %v298_v63 = vld [vmem:[#allocation7 + $0x18] sm:$0xff] }
  0x41   :  { %606 = vmatprep.subr.mxu0 %v864_v2  ;;  %635 = vmatprep.subr.mxu1 %v864_v2  ;;  %v297_v0 = vld [vmem:[#allocation7 + $0x10] sm:$0xff]  ;;  %v295_v3 = vld [vmem:[#allocation7] sm:$0xff]  ;;  %v415_v4 = vld [vmem:[#allocation8 + $0x78] sm:$0xff] }
  0x42   :  { %607 = vmatpush3.msra.mxu0 %v113_v17  ;;  %636 = vmatpush3.msra.mxu1 %v202_v20  ;;  %v414_v5 = vld [vmem:[#allocation8 + $0x70] sm:$0xff]  ;;  %v413_v6 = vld [vmem:[#allocation8 + $0x68] sm:$0xff]  ;;  %v412_v7 = vld [vmem:[#allocation8 + $0x60] sm:$0xff] }
  0x43   :  { %608 = vmatprep.subr.mxu0 %v864_v2  ;;  %637 = vmatprep.subr.mxu1 %v864_v2  ;;  %v411_v8 = vld [vmem:[#allocation8 + $0x58] sm:$0xff]  ;;  %v410_v9 = vld [vmem:[#allocation8 + $0x50] sm:$0xff]  ;;  %v409_v10 = vld [vmem:[#allocation8 + $0x48] sm:$0xff] }
  0x44   :  { %609 = vmatpush3.msra.mxu0 %v112_v19  ;;  %638 = vmatpush3.msra.mxu1 %v201_v22  ;;  %v408_v11 = vld [vmem:[#allocation8 + $0x40] sm:$0xff]  ;;  %v407_v12 = vld [vmem:[#allocation8 + $0x38] sm:$0xff]  ;;  %v406_v13 = vld [vmem:[#allocation8 + $0x30] sm:$0xff] }
  0x45   :  { %610 = vmatprep.subr.mxu0 %v864_v2  ;;  %639 = vmatprep.subr.mxu1 %v864_v2  ;;  %v405_v14 = vld [vmem:[#allocation8 + $0x28] sm:$0xff]  ;;  %v513_v15 = vld [vmem:[%s1036_s5] ss:$0 sm:$0xff]  ;;  %v514_v18 = vld [vmem:[%s1036_s5 + $0x1] ss:$0 sm:$0xff] }
  0x46   :  { %611 = vmatpush3.msra.mxu0 %v111_v21  ;;  %640 = vmatpush3.msra.mxu1 %v200_v24  ;;  %v515_v21 = vld [vmem:[%s1036_s5 + $0x2] ss:$0 sm:$0xff]  ;;  %v404_v24 = vld [vmem:[#allocation8 + $0x20] sm:$0xff] }
  0x47   :  { %612 = vmatprep.subr.mxu0 %v864_v2  ;;  %641 = vmatprep.subr.mxu1 %v864_v2 }
  0x48   :  { %613 = vmatpush3.msra.mxu0 %v110_v23  ;;  %642 = vmatpush3.msra.mxu1 %v199_v26  ;;  %v402_v26 = vld [vmem:[#allocation8 + $0x10] sm:$0xff] }
  0x49   :  { %614 = vmatprep.subr.mxu0 %v864_v2  ;;  %643 = vmatprep.subr.mxu1 %v864_v2 }
  0x4a   :  { %615 = vmatpush3.msra.mxu0 %v109_v25  ;;  %644 = vmatpush3.msra.mxu1 %v198_v28  ;;  %v403_v25 = vld [vmem:[#allocation8 + $0x18] sm:$0xff]  ;;  %v400_v28 = vld [vmem:[#allocation8] sm:$0xff] }
  0x4b   :  { %616 = vmatprep.subr.mxu0 %v864_v2  ;;  %645 = vmatprep.subr.mxu1 %v864_v2 }
  0x4c   :  { %617 = vmatpush3.msra.mxu0 %v108_v27  ;;  %646 = vmatpush3.msra.mxu1 %v197_v30  ;;  %v401_v27 = vld [vmem:[#allocation8 + $0x8] sm:$0xff] }
  0x4d   :  { %618 = vmatprep.subr.mxu0 %v864_v2  ;;  %647 = vmatprep.subr.mxu1 %v864_v2 }
  0x4e   :  { %619 = vmatpush3.msra.mxu0 %v107_v29  ;;  %648 = vmatpush3.msra.mxu1 %v196_v32  ;;  %v517_v29 = vld [vmem:[%s1036_s5 + $0x4] ss:$0 sm:$0xff]  ;;  %v519_v32 = vld [vmem:[%s1036_s5 + $0x5] ss:$0 sm:$0xff] }
  0x4f   :  { %620 = vmatprep.subr.mxu0 %v864_v2  ;;  %649 = vmatprep.subr.mxu1 %v864_v2 }
  0x50   :  { %621 = vmatpush3.msra.mxu0 %v106_v31  ;;  %650 = vmatpush3.msra.mxu1 %v195_v34 }
  0x51   :  { %622 = vmatprep.subr.mxu0 %v864_v2  ;;  %651 = vmatprep.subr.mxu1 %v864_v2 }
  0x52   :  { %623 = vmatpush3.msra.mxu0 %v105_v33  ;;  %652 = vmatpush3.msra.mxu1 %v194_v35  ;;  %v521_v35 = vld [vmem:[%s1036_s5 + $0x6] ss:$0 sm:$0xff] }
  0x53   :  { %662 = vmatprep.subr.mxu0 %v864_v2  ;;  %747 = vset.pattern.permute.xlu0 %v863_v1  ;;  %v296_v1 = vld [vmem:[#allocation7 + $0x8] sm:$0xff] }
  0x54   :  { %653 = vmatprep.subr.mxu1 %v864_v2 }
  0x55   :  { %654 = vmatpush3.msra.mxu1 %v193_v36 }
  0x56   :  { %655 = vmatprep.subr.mxu1 %v864_v2 }
  0x57   :  { %656 = vmatpush3.msra.mxu1 %v192_v37  ;;  %v523_v37 = vld [vmem:[%s1036_s5 + $0x8] ss:$0 sm:$0xff] }
  0x58   :  { %657 = vmatprep.subr.mxu1 %v864_v2 }
  0x59   :  { %658 = vmatpush3.msra.mxu1 %v191_v48 }
  0x5a   :  { %697 = vmatprep.subr.mxu1 %v864_v2 }
  0xaf   :  { %v84_v40 = vpop.permute.xlu0 %83 }
  0xb0   :  { %v100_v41 = vpop.permute.xlu1 %99  ;;  %vm85_vm1 = vcmp.eq.s32.totalorder %v84_v40, %v80_v39 }
  0xb1   :  { %vm101_vm2 = vcmp.eq.s32.totalorder %v100_v41, %v80_v39  ;;  %v510_v43 = vsel %vm85_vm1, 1.0, %v864_v2 }
  0xb2   :  { %v512_v45 = vsel %vm101_vm2, 1.0, %v864_v2 }
  0xb4   :  { %v92_v42 = vpop.permute.xlu0 %91 }
  0xb5   :  { %vm93_vm3 = vcmp.eq.s32.totalorder %v92_v42, %v80_v39 }
  0xb6   :  { %v511_v44 = vsel %vm93_vm3, 1.0, %v864_v2 }
  0xb7   :  { %v96_v46 = vadd.f32 %v511_v44, %v510_v43 }
  0xb9   :  { %v104_v47 = vadd.f32 %v512_v45, %v96_v46 }
  0xbb   :  { %625 = vmatmul.mubr.f32.vlgmr.msra.gmra.mxu0 %v104_v47 }
  0xbc   :  { %694 = vmatprep.mubr.msk.f32.mxu0 %vm866_vm0, %v864_v2  ;;  %663 = vmatpush3.msra.mxu0 %v310_v49 }
  0xbd   :  { %664 = vmatprep.subr.mxu0 %v864_v2 }
  0xbe   :  { %665 = vmatpush3.msra.mxu0 %v309_v50 }
  0xbf   :  { %666 = vmatprep.subr.mxu0 %v864_v2 }
  0xc0   :  { %667 = vmatpush3.msra.mxu0 %v308_v51 }
  0xc1   :  { %668 = vmatprep.subr.mxu0 %v864_v2 }
  0xc2   :  { %669 = vmatpush3.msra.mxu0 %v307_v52 }
  0xc3   :  { %670 = vmatprep.subr.mxu0 %v864_v2 }
  0xc4   :  { %671 = vmatpush3.msra.mxu0 %v306_v53 }
  0xc5   :  { %672 = vmatprep.subr.mxu0 %v864_v2 }
  0xc6   :  { %673 = vmatpush3.msra.mxu0 %v305_v54 }
  0xc7   :  { %674 = vmatprep.subr.mxu0 %v864_v2 }
  0xc8   :  { %675 = vmatpush3.msra.mxu0 %v304_v55 }
  0xc9   :  { %676 = vmatprep.subr.mxu0 %v864_v2 }
  0xca   :  { %677 = vmatpush3.msra.mxu0 %v303_v56 }
  0xcb   :  { %678 = vmatprep.subr.mxu0 %v864_v2 }
  0xcc   :  { %679 = vmatpush3.msra.mxu0 %v302_v57 }
  0xcd   :  { %680 = vmatprep.subr.mxu0 %v864_v2 }
  0xce   :  { %681 = vmatpush3.msra.mxu0 %v301_v58 }
  0xcf   :  { %682 = vmatprep.subr.mxu0 %v864_v2 }
  0xd0   :  { %683 = vmatpush3.msra.mxu0 %v300_v59 }
  0xd1   :  { %684 = vmatprep.subr.mxu0 %v864_v2 }
  0xd2   :  { %685 = vmatpush3.msra.mxu0 %v299_v62 }
  0xd3   :  { %686 = vmatprep.subr.mxu0 %v864_v2 }
  0xd4   :  { %687 = vmatpush3.msra.mxu0 %v298_v63 }
  0xd5   :  { %688 = vmatprep.subr.mxu0 %v864_v2 }
  0xd6   :  { %689 = vmatpush3.msra.mxu0 %v297_v0 }
  0xd7   :  { %690 = vmatprep.subr.mxu0 %v864_v2 }
  0xd8   :  { %691 = vmatpush3.msra.mxu0 %v296_v1 }
  0xd9   :  { %692 = vmatprep.subr.mxu0 %v864_v2 }
  0xda   :  { %693 = vmatpush3.msra.mxu0 %v295_v3 }
 0x17b   :  { %v187_v60 = vpop.f32.mrf.mxu0 }
 0x17c   :  { %660 = vmatmul.mubr.f32.vlgmr.msra.gmra.mxu1 %v187_v60 }
 0x17d   :  { %v626_v61 = vpop.f32.mrf.mxu0  ;;  %729 = vmatprep.mubr.msk.f32.mxu1 %vm866_vm0, %v864_v2  ;;  %698 = vmatpush3.msra.mxu1 %v415_v4 }
 0x17e   :  { %699 = vmatprep.subr.mxu1 %v864_v2 }
 0x17f   :  { %700 = vmatpush3.msra.mxu1 %v414_v5 }
 0x180   :  { %701 = vmatprep.subr.mxu1 %v864_v2 }
 0x181   :  { %702 = vmatpush3.msra.mxu1 %v413_v6 }
 0x182   :  { %703 = vmatprep.subr.mxu1 %v864_v2 }
 0x183   :  { %704 = vmatpush3.msra.mxu1 %v412_v7 }
 0x184   :  { %705 = vmatprep.subr.mxu1 %v864_v2 }
 0x185   :  { %706 = vmatpush3.msra.mxu1 %v411_v8 }
 0x186   :  { %707 = vmatprep.subr.mxu1 %v864_v2 }
 0x187   :  { %708 = vmatpush3.msra.mxu1 %v410_v9 }
 0x188   :  { %709 = vmatprep.subr.mxu1 %v864_v2 }
 0x189   :  { %710 = vmatpush3.msra.mxu1 %v409_v10 }
 0x18a   :  { %711 = vmatprep.subr.mxu1 %v864_v2 }
 0x18b   :  { %712 = vmatpush3.msra.mxu1 %v408_v11 }
 0x18c   :  { %713 = vmatprep.subr.mxu1 %v864_v2 }
 0x18d   :  { %714 = vmatpush3.msra.mxu1 %v407_v12 }
 0x18e   :  { %715 = vmatprep.subr.mxu1 %v864_v2 }
 0x18f   :  { %716 = vmatpush3.msra.mxu1 %v406_v13 }
 0x190   :  { %717 = vmatprep.subr.mxu1 %v864_v2 }
 0x191   :  { %718 = vmatpush3.msra.mxu1 %v405_v14 }
 0x192   :  { %719 = vmatprep.subr.mxu1 %v864_v2 }
 0x193   :  { %720 = vmatpush3.msra.mxu1 %v404_v24 }
 0x194   :  { %721 = vmatprep.subr.mxu1 %v864_v2 }
 0x195   :  { %722 = vmatpush3.msra.mxu1 %v403_v25 }
 0x196   :  { %723 = vmatprep.subr.mxu1 %v864_v2 }
 0x197   :  { %724 = vmatpush3.msra.mxu1 %v402_v26 }
 0x198   :  { %725 = vmatprep.subr.mxu1 %v864_v2 }
 0x199   :  { %726 = vmatpush3.msra.mxu1 %v401_v27 }
 0x19a   :  { %727 = vmatprep.subr.mxu1 %v864_v2 }
 0x19b   :  { %728 = vmatpush3.msra.mxu1 %v400_v28 }
 0x23c   :  { %v278_v16 = vpop.f32.mrf.mxu1 }
 0x23d   :  { %v279_v17 = vadd.f32 %v513_v15, %v278_v16 }
 0x23e   :  { %v661_v19 = vpop.f32.mrf.mxu1 }
 0x23f   :  { %v282_v20 = vmax.f32 %v279_v17, 0.0 }
 0x241   :  { %v288_v22 = vmul.f32 %v514_v18, %v282_v20 }
 0x243   :  { %v294_v23 = vadd.f32 %v515_v21, %v288_v22 }
 0x245   :  { %695 = vmatmul.mubr.f32.vlgmr.msra.gmra.mxu0 %v294_v23 }
 0x305   :  { %v383_v30 = vpop.f32.mrf.mxu0 }
 0x306   :  { %v384_v31 = vadd.f32 %v517_v29, %v383_v30 }
 0x307   :  { %v696_v33 = vpop.f32.mrf.mxu0 }
 0x308   :  { %v387_v34 = vmax.f32 %v384_v31, 0.0 }
 0x30a   :  { %v393_v36 = vmul.f32 %v519_v32, %v387_v34 }
 0x30c   :  { %v399_v2 = vadd.f32 %v521_v35, %v393_v36 }
 0x30e   :  { %730 = vmatmul.mubr.f32.vlgmr.msra.gmra.mxu1 %v399_v2 }
 0x3ce   :  { %v488_v38 = vpop.f32.mrf.mxu1 }
 0x3cf   :  { %v489_v39 = vadd.f32 %v523_v37, %v488_v38 }
 0x3d0   :  { %v731_v40 = vpop.f32.mrf.mxu1 }
 0x3d1   :  { %492 = vst [vmem:[#allocation10] sm:$0xff] %v489_v39 }
 0x3d2   :  { %839 = shalt.err (!%p836_p10)
}
 0x3d3   :  { %502 = dma.vmem_to_hbm [thread:$0]  %s500_s7, 128, %s1037_s6, [#allocation4]  }
 0x3d4   :  { %854 = dma.done.wait [#allocation4], 128  }
 0x3d5   :  { %855 = vsyncadd [#allocation4], 4294967168 }
 0x3d6   :  { %506 = vsyncpa [#allocation3], 1 }
 0x3d7   :  { %507 = vsyncpa [#allocation6], 1 }
 0x3d8   :  { %508 = vsyncpa [#allocation9], 1 }
 0x3d9   :  { %509 = vsyncpa [#allocation4], 1 }

</bundles_post_ra>
